<compile_context>
chip_gen: v7x
topology: tpu7x:2x2x1
jax: 0.10.0
libtpu: 0.0.40
codegen_flags: <defaults>
</compile_context>

<pallas_src>
import functools

import jax
import jax.numpy as jnp
from jax.experimental import pallas as pl
from jax.experimental.pallas import tpu as pltpu

KSIZE = 7
PAD = 3  # padding = 3 for kernel_size = 7 (matches the PyTorch module)


def _round_up(x, m):
    return ((x + m - 1) // m) * m


def _pick_batch_block(n, cap=8):
    """Largest divisor of n that is (a multiple of 8 or == n) and <= cap."""
    cands = [d for d in range(1, n + 1) if n % d == 0 and (d == n or d % 8 == 0)]
    fits = [d for d in cands if d <= cap]
    return max(fits) if fits else min(cands)


def _pick_channel_block(c, nb, hw, budget_bytes=12 * 1024 * 1024):
    """Largest divisor of c (multiple of 8 or == c) whose double-buffered
    (nb, tc, hw) f32 input block fits the VMEM budget."""
    cands = [d for d in range(1, c + 1) if c % d == 0 and (d == c or d % 8 == 0)]
    fits = [d for d in cands if 2 * nb * d * hw * 4 <= budget_bytes]
    return max(fits) if fits else min(cands)


# --------------------------- Stage 1: reduction ---------------------------

def _spa_reduce_kernel(x_ref, maps_ref, sum_ref, max_ref, *, n_channels):
    """Running channel sum/max across the C grid axis (grid axis 1).

    x_ref:    (nb, tc, HW) f32  -- one (batch-block, channel-block) slab
    maps_ref: (2, nb, HW)  f32  -- [avg, max], written on the last C step
    sum_ref / max_ref: (nb, HW) f32 VMEM scratch (persist across the C axis)
    """
    c_idx = pl.program_id(1)

    @pl.when(c_idx == 0)
    def _init():
        sum_ref[...] = jnp.zeros_like(sum_ref)
        max_ref[...] = jnp.full_like(max_ref, -jnp.inf)

    x = x_ref[...]                                   # (nb, tc, HW)
    sum_ref[...] += jnp.sum(x, axis=1)
    max_ref[...] = jnp.maximum(max_ref[...], jnp.max(x, axis=1))

    @pl.when(c_idx == pl.num_programs(1) - 1)
    def _finalize():
        maps_ref[0] = sum_ref[...] * (1.0 / n_channels)   # channel mean
        maps_ref[1] = max_ref[...]                        # channel max


# ------------------------ Stage 2: 7x7 conv + sigmoid ----------------------

def _spa_conv_kernel(w_ref, maps_ref, o_ref, *, height, width):
    """7x7 conv (2 in-channels -> 1 out-channel, bias=False) + sigmoid.

    w_ref:    (2*7*7,) f32 SMEM  -- flattened OIHW conv weight (I-major)
    maps_ref: (2, nb, H, W) f32  -- [avg, max] channel maps
    o_ref:    (1, nb, H, W) f32
    """
    nb = maps_ref.shape[1]
    hp = _round_up(height + 2 * PAD, 8)     # sublane-aligned padded height
    wp = _round_up(width + 2 * PAD, 128)    # lane-aligned padded width

    zeros = jnp.zeros((nb, hp, wp), jnp.float32)
    acc = jnp.zeros((nb, height, width), jnp.float32)
    for ci in range(2):                     # in-channel order: [avg, max]
        padded = jax.lax.dynamic_update_slice(zeros, maps_ref[ci], (0, PAD, PAD))
        for kw in range(KSIZE):
            # Hoist the kw (lane) shift out of the kh loop: 7 rolls per map
            # instead of 49 unaligned (kh, kw) window relayouts.
            rolled = padded if kw == 0 else pltpu.roll(padded, shift=wp - kw, axis=2)
            for kh in range(KSIZE):
                wgt = w_ref[ci * KSIZE * KSIZE + kh * KSIZE + kw]
                win = jax.lax.slice(rolled, (0, kh, 0), (nb, kh + height, width))
                acc = acc + wgt * win
    o_ref[0] = jax.nn.sigmoid(acc)


# -------------------------------- Wrapper ----------------------------------

def spa_forward(x, weight, *, nb=None, tc=None,
                vmem_limit_bytes=48 * 1024 * 1024):
    """x: (N, C, H, W) f32, weight: (1, 2, 7, 7) f32 -> (N, 1, H, W) f32."""
    n, c, h, w = x.shape
    hw = h * w
    x = x.astype(jnp.float32)
    w_flat = weight.astype(jnp.float32).reshape(-1)
    assert w_flat.shape == (2 * KSIZE * KSIZE,)

    if nb is None:
        nb = _pick_batch_block(n)
    if tc is None:
        tc = _pick_channel_block(c, nb, hw)
    assert n % nb == 0 and (nb == n or nb % 8 == 0), (n, nb)
    assert c % tc == 0 and (tc == c or tc % 8 == 0), (c, tc)

    # ---- Stage 1: channel mean/max, lane-dense over H*W -------------------
    x_flat = x.reshape(n, c, hw)            # free: row-major contiguous
    maps_flat = pl.pallas_call(
        functools.partial(_spa_reduce_kernel, n_channels=c),
        out_shape=jax.ShapeDtypeStruct((2, n, hw), jnp.float32),
        grid=(n // nb, c // tc),
        in_specs=[pl.BlockSpec((nb, tc, hw), lambda i, k: (i, k, 0))],
        out_specs=pl.BlockSpec((2, nb, hw), lambda i, k: (0, i, 0)),
        scratch_shapes=[pltpu.VMEM((nb, hw), jnp.float32),
                        pltpu.VMEM((nb, hw), jnp.float32)],
        compiler_params=pltpu.CompilerParams(
            dimension_semantics=("parallel", "arbitrary"),
            vmem_limit_bytes=vmem_limit_bytes),
    )(x_flat)

    # ---- Stage 2: 7x7 conv + sigmoid on the two maps -----------------------
    maps = maps_flat.reshape(2, n, h, w)    # free: row-major contiguous
    out = pl.pallas_call(
        functools.partial(_spa_conv_kernel, height=h, width=w),
        out_shape=jax.ShapeDtypeStruct((1, n, h, w), jnp.float32),
        grid=(n // nb,),
        in_specs=[pl.BlockSpec(memory_space=pltpu.MemorySpace.SMEM),
                  pl.BlockSpec((2, nb, h, w), lambda i: (0, i, 0, 0))],
        out_specs=pl.BlockSpec((1, nb, h, w), lambda i: (0, i, 0, 0)),
        compiler_params=pltpu.CompilerParams(
            dimension_semantics=("parallel",),
            vmem_limit_bytes=vmem_limit_bytes),
    )(w_flat, maps)

    return out.reshape(n, 1, h, w)          # free: same contiguous order


def spa_reference(x, weight):
    """Pure-JAX reference mirroring the PyTorch forward (correctness check)."""
    avg = jnp.mean(x, axis=1, keepdims=True)
    mx = jnp.max(x, axis=1, keepdims=True)
    cat = jnp.concatenate([avg, mx], axis=1)            # (N, 2, H, W)
    y = jax.lax.conv_general_dilated(
        cat, weight, window_strides=(1, 1), padding=((PAD, PAD), (PAD, PAD)),
        dimension_numbers=("NCHW", "OIHW", "NCHW"))
    return jax.nn.sigmoid(y)


if __name__ == "__main__":
    key = jax.random.PRNGKey(0)
    k_x, k_w, k_x2 = jax.random.split(key, 3)

    N, C, H, W = 2, 4, 16, 16
    x = jax.random.normal(k_x, (N, C, H, W), dtype=jnp.float32)
    # Synthetic conv1 weight, shape (out=1, in=2, 7, 7), no bias.
    weight = jax.random.normal(k_w, (1, 2, KSIZE, KSIZE), dtype=jnp.float32) * 0.1

    out = jax.block_until_ready(spa_forward(x, weight))
    ref = jax.block_until_ready(spa_reference(x, weight))
    assert out.shape == (N, 1, H, W)
    assert jnp.allclose(out, ref, atol=1e-5, rtol=1e-5), "mismatch (case 1)"

    # Second case exercises the C-tiled running sum/max path (2 steps along C).
    C2 = 16
    x2 = jax.random.normal(k_x2, (N, C2, H, W), dtype=jnp.float32)
    out2 = jax.block_until_ready(spa_forward(x2, weight, tc=8))
    ref2 = jax.block_until_ready(spa_reference(x2, weight))
    assert jnp.allclose(out2, ref2, atol=1e-5, rtol=1e-5), "mismatch (case 2)"

    print("KERNEL_OK")
</pallas_src>

<mosaic_0001>
module attributes {stable_mosaic.version = 11 : i64} {
  func.func @_spa_reduce_kernel(%arg0: i32, %arg1: i32, %arg2: memref<2x4x256xf32, #tpu.memory_space<vmem>>, %arg3: memref<2x2x256xf32, #tpu.memory_space<vmem>>, %arg4: memref<2x256xf32, #tpu.memory_space<vmem>>, %arg5: memref<2x256xf32, #tpu.memory_space<vmem>>) attributes {dimension_semantics = [#tpu.dimension_semantics<parallel>, #tpu.dimension_semantics<arbitrary>], iteration_bounds = array<i64: 1, 1>, scalar_prefetch = 0 : i64, scratch_operands = 2 : i64, tpu.core_type = #tpu.core_type<tc>, window_params = [{transform_indices = @transform_0, window_bounds = array<i64: 2, 4, 256>}, {transform_indices = @transform_1, window_bounds = array<i64: 2, 2, 256>}]} {
    %c0_i32 = arith.constant 0 : i32
    %0 = arith.cmpi eq, %arg1, %c0_i32 : i32
    %1 = arith.extui %0 : i1 to i32
    %c0_i32_0 = arith.constant 0 : i32
    %2 = arith.cmpi ne, %1, %c0_i32_0 : i32
    scf.if %2 {
      %cst_14 = arith.constant 0.000000e+00 : f32
      %15 = vector.broadcast %cst_14 : f32 to vector<2x256xf32>
      %c0_15 = arith.constant 0 : index
      %c0_16 = arith.constant 0 : index
      %16 = vector.load %arg4[%c0_15, %c0_16] : memref<2x256xf32, #tpu.memory_space<vmem>>, vector<2x256xf32>
      tpu.vector_store %arg4[%c0_15, %c0_16], %15 {strides = array<i32>} : memref<2x256xf32, #tpu.memory_space<vmem>>, vector<2x256xf32>,
      %cst_17 = arith.constant 0xFF800000 : f32
      %17 = vector.broadcast %cst_17 : f32 to vector<2x256xf32>
      %c0_18 = arith.constant 0 : index
      %c0_19 = arith.constant 0 : index
      %18 = vector.load %arg5[%c0_18, %c0_19] : memref<2x256xf32, #tpu.memory_space<vmem>>, vector<2x256xf32>
      tpu.vector_store %arg5[%c0_18, %c0_19], %17 {strides = array<i32>} : memref<2x256xf32, #tpu.memory_space<vmem>>, vector<2x256xf32>,
    } else {
    }
    %c0 = arith.constant 0 : index
    %c0_1 = arith.constant 0 : index
    %c0_2 = arith.constant 0 : index
    %3 = vector.load %arg2[%c0, %c0_1, %c0_2] : memref<2x4x256xf32, #tpu.memory_space<vmem>>, vector<2x4x256xf32>
    %c0_3 = arith.constant 0 : index
    %c0_4 = arith.constant 0 : index
    %4 = vector.load %arg4[%c0_3, %c0_4] : memref<2x256xf32, #tpu.memory_space<vmem>>, vector<2x256xf32>
    %cst = arith.constant dense<0.000000e+00> : vector<2x256xf32>
    %5 = vector.multi_reduction <add>, %3, %cst [1] : vector<2x4x256xf32> to vector<2x256xf32>
    %6 = arith.addf %4, %5 : vector<2x256xf32>
    %c0_5 = arith.constant 0 : index
    %c0_6 = arith.constant 0 : index
    %7 = vector.load %arg4[%c0_5, %c0_6] : memref<2x256xf32, #tpu.memory_space<vmem>>, vector<2x256xf32>
    tpu.vector_store %arg4[%c0_5, %c0_6], %6 {strides = array<i32>} : memref<2x256xf32, #tpu.memory_space<vmem>>, vector<2x256xf32>,
    %c0_7 = arith.constant 0 : index
    %c0_8 = arith.constant 0 : index
    %8 = vector.load %arg5[%c0_7, %c0_8] : memref<2x256xf32, #tpu.memory_space<vmem>>, vector<2x256xf32>
    %cst_9 = arith.constant dense<0xFF800000> : vector<2x256xf32>
    %9 = vector.multi_reduction <maximumf>, %3, %cst_9 [1] : vector<2x4x256xf32> to vector<2x256xf32>
    %10 = arith.maximumf %8, %9 : vector<2x256xf32>
    %c0_10 = arith.constant 0 : index
    %c0_11 = arith.constant 0 : index
    %11 = vector.load %arg5[%c0_10, %c0_11] : memref<2x256xf32, #tpu.memory_space<vmem>>, vector<2x256xf32>
    tpu.vector_store %arg5[%c0_10, %c0_11], %10 {strides = array<i32>} : memref<2x256xf32, #tpu.memory_space<vmem>>, vector<2x256xf32>,
    %c0_i32_12 = arith.constant 0 : i32
    %12 = arith.cmpi eq, %arg1, %c0_i32_12 : i32
    %13 = arith.extui %12 : i1 to i32
    %c0_i32_13 = arith.constant 0 : i32
    %14 = arith.cmpi ne, %13, %c0_i32_13 : i32
    scf.if %14 {
      %c0_14 = arith.constant 0 : index
      %c0_15 = arith.constant 0 : index
      %15 = vector.load %arg4[%c0_14, %c0_15] : memref<2x256xf32, #tpu.memory_space<vmem>>, vector<2x256xf32>
      %cst_16 = arith.constant 2.500000e-01 : f32
      %16 = vector.broadcast %cst_16 : f32 to vector<2x256xf32>
      %17 = arith.mulf %15, %16 : vector<2x256xf32>
      %c0_17 = arith.constant 0 : index
      %c0_18 = arith.constant 0 : index
      %c0_19 = arith.constant 0 : index
      %18 = vector.load %arg3[%c0_17, %c0_18, %c0_19] : memref<2x2x256xf32, #tpu.memory_space<vmem>>, vector<1x2x256xf32>
      %19 = vector.shape_cast %18 : vector<1x2x256xf32> to vector<2x256xf32>
      %20 = vector.shape_cast %17 : vector<2x256xf32> to vector<1x2x256xf32>
      tpu.vector_store %arg3[%c0_17, %c0_18, %c0_19], %20 {strides = array<i32>} : memref<2x2x256xf32, #tpu.memory_space<vmem>>, vector<1x2x256xf32>,
      %c0_20 = arith.constant 0 : index
      %c0_21 = arith.constant 0 : index
      %21 = vector.load %arg5[%c0_20, %c0_21] : memref<2x256xf32, #tpu.memory_space<vmem>>, vector<2x256xf32>
      %c1 = arith.constant 1 : index
      %c0_22 = arith.constant 0 : index
      %c0_23 = arith.constant 0 : index
      %22 = vector.load %arg3[%c1, %c0_22, %c0_23] : memref<2x2x256xf32, #tpu.memory_space<vmem>>, vector<1x2x256xf32>
      %23 = vector.shape_cast %22 : vector<1x2x256xf32> to vector<2x256xf32>
      %24 = vector.shape_cast %21 : vector<2x256xf32> to vector<1x2x256xf32>
      tpu.vector_store %arg3[%c1, %c0_22, %c0_23], %24 {strides = array<i32>} : memref<2x2x256xf32, #tpu.memory_space<vmem>>, vector<1x2x256xf32>,
    } else {
    }
    return
  }
  func.func @transform_0(%arg0: i32, %arg1: i32) -> (i32, i32, i32) {
    %c0_i32 = arith.constant 0 : i32
    %c0_i32_0 = arith.constant 0 : i32
    return %arg0, %arg1, %c0_i32 : i32, i32, i32
  }
  func.func @transform_1(%arg0: i32, %arg1: i32) -> (i32, i32, i32) {
    %c0_i32 = arith.constant 0 : i32
    %c0_i32_0 = arith.constant 0 : i32
    %c0_i32_1 = arith.constant 0 : i32
    return %c0_i32, %arg0, %c0_i32_0 : i32, i32, i32
  }
}

</mosaic_0001>

<bundles_post_ra>
// kernel: tpu_custom_call.1
= control target key start
LH: loop header
LB: loop body
LE: loop exit
PB: predicated region body
PF: predicated region fallthrough
CT: control target
= control target key end

     0   :  { %6 = vsyncpa [#allocation5], 0  ;;  %s298_s0 = inlined_call_operand.hbm [shape: f32[2,4,256], index: 0, kind: input, shape index: {}]   ;;  %s299_s1 = inlined_call_operand.hbm [shape: f32[2,2,256], index: 1, kind: output, shape index: {}]  }
   0x1   :  { %7 = vsyncpa [#allocation6], 0  ;;  %s247_s6 = smov [#allocation4]   ;;  %s199_s10 = scalar_lea.hbm %s298_s0, 256 }
   0x2   :  { %s13_s7 = sshll.u32 %s247_s6, 4  ;;  %p200_p0 = scmp.ne.s32.totalorder %s298_s0, %s199_s10  ;;  %s14_s7 = int_to_ptr.vmem [resolvable:$true] %s13_s7 }
   0x3   :  { %p203_p1 = scmp.lt.u32.totalorder %s199_s10, %s298_s0 }
   0x5   :  { %p205_p2 = pnand %p203_p1, %p200_p0 }
   0x7   :  { %208 = shalt.err (!%p205_p2)
}
   0x8   :  { %s209_s15 = scalar_lea.vmem %s14_s7, 256  ;;  %p214_p4 = scmp.lt.s32.totalorder %s14_s7, %s14_s7 }
   0x9   :  { %p210_p3 = scmp.ne.s32.totalorder %s14_s7, %s209_s15  ;;  %p215_p5 = scmp.lt.s32.totalorder %s209_s15, %s209_s15 }
   0xb   :  { %p216_p6 = por %p215_p5, %p214_p4 }
   0xd   :  { %p217_p7 = pnand %p216_p6, %p210_p3 }
   0xf   :  { %220 = shalt.err (!%p217_p7)
}
  0x10   :  { %s248_s16 = smov 128   ;;  %s249_s17 = smov 8  }
  0x11   :  { %19 = dma.hbm_to_vmem [thread:$0]  %s298_s0, 256, %s14_s7, [#allocation5], %s248_s16, %s248_s16, %s249_s17  }
  0x12   :  { %243 = dma.done.wait [#allocation5], 256  }
  0x13   :  { %244 = vsyncadd [#allocation5], 4294967040  ;;  %v250_v0 = vmov 0.0   ;;  %v251_v1 = vmov -inf   ;;  %v252_v2 = vmov 1983009808   ;;  %v75_v4 = vlaneseq }
  0x14   :  { %27 = vst [vmem:[#allocation2] sm:$0xf] %v250_v0  ;;  %28 = vst [vmem:[#allocation3] sm:$0xf] %v251_v1  ;;  %v73_v3 = vunpack.c.l.s4 %v252_v2  ;;  %vm38_vm0 = vcmask 1043456   ;;  %v29_v5 = vld [vmem:[#allocation4] sm:$0xff] }
  0x15   :  { %v30_v6 = vld [vmem:[#allocation4 + $0x8] sm:$0xff]  ;;  %v76_v8 = vshrl.u32 %v75_v4, 7  ;;  %v34_v9 = vcombine.high %v29_v5, %v29_v5  ;;  %v39_v11 = vsel %vm38_vm0, %v29_v5, 0.0  ;;  %v104_v15 = vsel %vm38_vm0, %v29_v5, -inf  ;;  %s253_s0 = smov [#allocation7]  }
  0x16   :  { %v74_v7 = vunpack.c.0.s8 %v73_v3  ;;  %v35_v10 = vcombine.high %v30_v6, %v30_v6  ;;  %v53_v12 = vsel %vm38_vm0, %v30_v6, 0.0  ;;  %v40_v13 = vrot.slane %v39_v11, 4  ;;  %s176_s20 = sshll.u32 %s253_s0, 4  ;;  %s177_s20 = int_to_ptr.vmem [resolvable:$true] %s176_s20 }
  0x17   :  { %v54_v14 = vrot.slane %v53_v12, 4  ;;  %v118_v16 = vsel %vm38_vm0, %v30_v6, -inf  ;;  %v46_v17 = vsel %vm38_vm0, %v34_v9, 0.0  ;;  %v105_v19 = vrot.slane %v104_v15, 4  ;;  %s221_s21 = scalar_lea.vmem %s177_s20, 128  ;;  %p226_p9 = scmp.lt.s32.totalorder %s177_s20, %s177_s20 }
  0x18   :  { %v60_v18 = vsel %vm38_vm0, %v35_v10, 0.0  ;;  %v111_v20 = vsel %vm38_vm0, %v34_v9, -inf  ;;  %v41_v21 = vadd.f32 %v40_v13, %v39_v11  ;;  %v47_v22 = vrot.slane %v46_v17, 4  ;;  %p222_p8 = scmp.ne.s32.totalorder %s177_s20, %s221_s21  ;;  %p227_p10 = scmp.lt.s32.totalorder %s221_s21, %s221_s21 }
  0x19   :  { %v55_v23 = vadd.f32 %v54_v14, %v53_v12  ;;  %v61_v24 = vrot.slane %v60_v18, 4  ;;  %v106_v25 = vmax.f32 %v104_v15, %v105_v19  ;;  %v112_v26 = vrot.slane %v111_v20, 4 }
  0x1a   :  { %v119_v27 = vrot.slane %v118_v16, 4  ;;  %v125_v28 = vsel %vm38_vm0, %v35_v10, -inf  ;;  %v42_v29 = vrot.slane %v41_v21, 2  ;;  %v48_v30 = vadd.f32 %v47_v22, %v46_v17  ;;  %p228_p11 = por %p227_p10, %p226_p9 }
  0x1b   :  { %v56_v31 = vrot.slane %v55_v23, 2  ;;  %v62_v32 = vadd.f32 %v61_v24, %v60_v18  ;;  %v107_v33 = vrot.slane %v106_v25, 2  ;;  %v113_v34 = vmax.f32 %v111_v20, %v112_v26 }
  0x1c   :  { %v120_v35 = vmax.f32 %v118_v16, %v119_v27  ;;  %v126_v36 = vrot.slane %v125_v28, 4  ;;  %v43_v37 = vadd.f32 %v42_v29, %v41_v21  ;;  %v49_v38 = vrot.slane %v48_v30, 2  ;;  %v31_v16 = vld [vmem:[#allocation2] sm:$0xf]  ;;  %v103_v21 = vld [vmem:[#allocation3] sm:$0xf]  ;;  %p229_p12 = pnand %p228_p11, %p222_p8 }
  0x1d   :  { %v57_v39 = vadd.f32 %v56_v31, %v55_v23  ;;  %v63_v40 = vrot.slane %v62_v32, 2  ;;  %v108_v41 = vmax.f32 %v106_v25, %v107_v33  ;;  %v114_v42 = vrot.slane %v113_v34, 2 }
  0x1e   :  { %v121_v43 = vrot.slane %v120_v35, 2  ;;  %v127_v44 = vmax.f32 %v125_v28, %v126_v36  ;;  %v44_v45 = vrot.slane %v43_v37, 1  ;;  %v50_v46 = vadd.f32 %v49_v38, %v48_v30 }
  0x1f   :  { %v58_v47 = vrot.slane %v57_v39, 1  ;;  %v64_v48 = vadd.f32 %v63_v40, %v62_v32  ;;  %v109_v49 = vrot.slane %v108_v41, 1  ;;  %v115_v50 = vmax.f32 %v113_v34, %v114_v42 }
  0x20   :  { %v122_v51 = vmax.f32 %v120_v35, %v121_v43  ;;  %v128_v52 = vrot.slane %v127_v44, 2  ;;  %v45_v53 = vadd.f32 %v44_v45, %v43_v37  ;;  %v51_v54 = vrot.slane %v50_v46, 1 }
  0x21   :  { %v59_v55 = vadd.f32 %v58_v47, %v57_v39  ;;  %v65_v56 = vrot.slane %v64_v48, 1  ;;  %v110_v57 = vmax.f32 %v108_v41, %v109_v49  ;;  %v116_v58 = vrot.slane %v115_v50, 1 }
  0x22   :  { %v123_v59 = vrot.slane %v122_v51, 1  ;;  %v129_v60 = vmax.f32 %v127_v44, %v128_v52  ;;  %v52_v61 = vadd.f32 %v51_v54, %v50_v46  ;;  %v77_v63 = vsub.s32 %v74_v7, %v76_v8 }
  0x23   :  { %v66_v62 = vadd.f32 %v65_v56, %v64_v48  ;;  %v117_v0 = vmax.f32 %v115_v50, %v116_v58  ;;  %vm92_vm1 = vcmask 1041409   ;;  %vm94_vm2 = vcmask 1043459  }
  0x24   :  { %v124_v1 = vmax.f32 %v122_v51, %v123_v59  ;;  %v130_v2 = vrot.slane %v129_v60, 1  ;;  %v71_v3 = vcombine.low %v45_v53, %v52_v61  ;;  %vm96_vm3 = vcmask 1045509  }
  0x25   :  { %v79_v4 = vcombine.low %v59_v55, %v66_v62  ;;  %v136_v6 = vcombine.low %v110_v57, %v117_v0  ;;  %vm98_vm4 = vcmask 1047559  }
  0x26   :  { %v131_v5 = vmax.f32 %v129_v60, %v130_v2  ;;  %v78_v9 = vrot.slane %v71_v3, %v77_v63 }
  0x27   :  { %v86_v10 = vrot.slane %v79_v4, %v77_v63  ;;  %v143_v13 = vrot.slane %v136_v6, %v77_v63 }
  0x28   :  { %v144_v11 = vcombine.low %v124_v1, %v131_v5 }
  0x29   :  { %v91_v12 = vrot.slane %v86_v10, 7 }
  0x2a   :  { %v151_v14 = vrot.slane %v144_v11, %v77_v63 }
  0x2b   :  { %v93_v15 = vsel %vm92_vm1, %v91_v12, %v78_v9 }
  0x2c   :  { %v95_v7 = vsel %vm94_vm2, %v91_v12, %v93_v15  ;;  %v154_v8 = vrot.slane %v151_v14, 7 }
  0x2d   :  { %v97_v17 = vsel %vm96_vm3, %v91_v12, %v95_v7 }
  0x2e   :  { %v99_v18 = vsel %vm98_vm4, %v91_v12, %v97_v17  ;;  %v155_v19 = vsel %vm92_vm1, %v154_v8, %v143_v13 }
  0x2f   :  { %v101_v20 = vadd.f32 %v99_v18, %v31_v16  ;;  %v156_v22 = vsel %vm94_vm2, %v154_v8, %v155_v19 }
  0x30   :  { %v157_v23 = vsel %vm96_vm3, %v154_v8, %v156_v22 }
  0x31   :  { %102 = vst [vmem:[#allocation2] sm:$0xf] %v101_v20  ;;  %v158_v24 = vsel %vm98_vm4, %v154_v8, %v157_v23 }
  0x32   :  { %v160_v25 = vmax.f32 %v103_v21, %v158_v24 }
  0x34   :  { %161 = vst [vmem:[#allocation3] sm:$0xf] %v160_v25 }
  0x38   :  { %v165_v26 = vld [vmem:[#allocation2] sm:$0xf] }
  0x39   :  { %v166_v27 = vmul.f32 0.25, %v165_v26 }
  0x3b   :  { %167 = vst [vmem:[#allocation7] sm:$0xf] %v166_v27  ;;  %v168_v28 = vld [vmem:[#allocation3] sm:$0xf] }
  0x3c   :  { %170 = vst [vmem:[#allocation7 + $0x4] sm:$0xf] %v168_v28 }
  0x3d   :  { %232 = shalt.err (!%p229_p12)
}
  0x3e   :  { %s233_s24 = scalar_lea.hbm %s299_s1, 128 }
  0x3f   :  { %p234_p13 = scmp.ne.s32.totalorder %s299_s1, %s233_s24  ;;  %p237_p0 = scmp.lt.u32.totalorder %s233_s24, %s299_s1 }
  0x41   :  { %p239_p1 = pnand %p237_p0, %p234_p13 }
  0x43   :  { %242 = shalt.err (!%p239_p1)
}
  0x44   :  { %s254_s29 = smov 64   ;;  %s255_s30 = smov 4  }
  0x45   :  { %182 = dma.vmem_to_hbm [thread:$0]  %s177_s20, 128, %s299_s1, [#allocation6], %s254_s29, %s254_s29, %s255_s30  }
  0x46   :  { %245 = dma.done.wait [#allocation6], 128  }
  0x47   :  { %246 = vsyncadd [#allocation6], 4294967168 }
  0x48   :  { %186 = vsyncpa [#allocation5], 1 }
  0x49   :  { %187 = vsyncpa [#allocation6], 1 }

</bundles_post_ra>
